<compile_context>
chip_gen: v5e
topology: v5e:2x2
jax: 0.10.0
libtpu: 0.0.40
codegen_flags: <defaults>
</compile_context>

<pallas_src>
import math

import jax
import jax.numpy as jnp
from jax.experimental import pallas as pl
from jax.experimental.pallas import tpu as pltpu


def _round_up(n, m):
    return ((n + m - 1) // m) * m


def _policy_kernel(x_ref, w1_ref, b1_ref, w2_ref, b2_ref, o_ref):
    # fc1 + ReLU  (MXU matmul, f32 accumulate; (1,H) bias broadcast is free
    # in the VALU slot).
    h = jnp.dot(x_ref[...], w1_ref[...], preferred_element_type=jnp.float32)
    h = jnp.maximum(h + b1_ref[...], 0.0)

    # fc2 -- narrow (tb, action_dim) logits, no lane padding.
    logits = jnp.dot(h, w2_ref[...], preferred_element_type=jnp.float32)
    logits = logits + b2_ref[...]

    # Numerically-stable softmax over the action axis (== torch dim=1),
    # computed only over the real action lanes.
    m = jnp.max(logits, axis=-1, keepdims=True)
    e = jnp.exp(logits - m)
    denom = jnp.sum(e, axis=-1, keepdims=True)
    # Divide on the EUP: approx reciprocal + one Newton refinement step
    # (needed to meet ~1e-4 tolerance; do not remove).
    r = pl.reciprocal(denom, approx=True)
    r = r * (2.0 - denom * r)
    o_ref[...] = (e * r).astype(o_ref.dtype)


def policy_net_discrete(x, w1, b1, w2, b2, *, block_b=8192, vmem_limit_bytes=None):
    """Forward pass of PolicyNetDiscrete.

    x:  [B, state_dim] float32
    w1: [state_dim, hidden_dim], b1: [hidden_dim]
    w2: [hidden_dim, action_dim], b2: [action_dim]
    returns: [B, action_dim] float32 probabilities (rows sum to 1)
    """
    B, state_dim = x.shape
    hidden_dim, action_dim = w2.shape
    assert w1.shape == (state_dim, hidden_dim)
    assert b1.shape == (hidden_dim,)
    assert b2.shape == (action_dim,)

    # ---- batch tile sizing -------------------------------------------------
    # Per-row f32 VMEM footprint: double-buffered x block + double-buffered
    # output block + the (tb, hidden) intermediate + a few narrow softmax
    # temps (logits/e/m/denom/r).  Resident weights are negligible.
    bytes_per_row = 4 * (2 * state_dim + hidden_dim + 4 * action_dim + 8)
    vmem_budget = 8 * 1024 * 1024  # safely under every scoped-VMEM default
    tb_cap = max(8, vmem_budget // bytes_per_row)

    # Keep >= 4 grid steps when B is large enough (megacore sharding on v7x,
    # pipeline overlap everywhere), never below one 8-row vreg.
    tb_split = _round_up(pl.cdiv(B, 4), 8)

    tb = max(8, min(block_b, tb_cap, tb_split))
    tb = max(8, (tb // 8) * 8)
    if tb >= 512:  # align large tiles to the 256-wide MXU on v6e/v7x
        tb = (tb // 256) * 256

    # Ragged last tile handled in-kernel by Pallas block clipping: rows are
    # independent, out-of-bounds rows are never written back.
    grid = (pl.cdiv(B, tb),)

    # Keep biases 2-D so they map cleanly onto (sublane, lane) vregs; the
    # broadcast over the batch tile happens inside the kernel.
    b1_2d = b1.reshape(1, hidden_dim)
    b2_2d = b2.reshape(1, action_dim)

    out = pl.pallas_call(
        _policy_kernel,
        out_shape=jax.ShapeDtypeStruct((B, action_dim), jnp.float32),
        grid=grid,
        in_specs=[
            pl.BlockSpec((tb, state_dim), lambda i: (i, 0)),          # x tile
            pl.BlockSpec((state_dim, hidden_dim), lambda i: (0, 0)),  # w1 (resident)
            pl.BlockSpec((1, hidden_dim), lambda i: (0, 0)),          # b1 (resident)
            pl.BlockSpec((hidden_dim, action_dim), lambda i: (0, 0)),  # w2 (resident)
            pl.BlockSpec((1, action_dim), lambda i: (0, 0)),          # b2 (resident)
        ],
        out_specs=pl.BlockSpec((tb, action_dim), lambda i: (i, 0)),
        compiler_params=pltpu.CompilerParams(
            dimension_semantics=("parallel",),  # 2x on v7x dual TensorCores
            vmem_limit_bytes=vmem_limit_bytes,
        ),
    )(x, w1, b1_2d, w2, b2_2d)
    return out


def init_params(key, state_dim, hidden_dim, action_dim):
    """Deterministic init mirroring torch.nn.Linear default U[-1/sqrt(fan_in), ...]."""
    k1, k2, k3, k4 = jax.random.split(key, 4)
    bound1 = 1.0 / math.sqrt(state_dim)
    bound2 = 1.0 / math.sqrt(hidden_dim)
    w1 = jax.random.uniform(k1, (state_dim, hidden_dim), jnp.float32, -bound1, bound1)
    b1 = jax.random.uniform(k2, (hidden_dim,), jnp.float32, -bound1, bound1)
    w2 = jax.random.uniform(k3, (hidden_dim, action_dim), jnp.float32, -bound2, bound2)
    b2 = jax.random.uniform(k4, (action_dim,), jnp.float32, -bound2, bound2)
    return w1, b1, w2, b2


def _reference(x, w1, b1, w2, b2):
    h = jnp.maximum(x @ w1 + b1, 0.0)
    return jax.nn.softmax(h @ w2 + b2, axis=1)


if __name__ == "__main__":
    # Small shapes consistent with the module: batch=8 states of dim 4,
    # hidden_dim=32, action_dim=2 (CartPole-like policy).
    batch, state_dim, hidden_dim, action_dim = 8, 4, 32, 2

    key = jax.random.PRNGKey(0)
    kx, kp, kx2 = jax.random.split(key, 3)
    x = jax.random.normal(kx, (batch, state_dim), dtype=jnp.float32)
    w1, b1, w2, b2 = init_params(kp, state_dim, hidden_dim, action_dim)

    probs = policy_net_discrete(x, w1, b1, w2, b2)
    jax.block_until_ready(probs)

    ref = _reference(x, w1, b1, w2, b2)
    assert probs.shape == (batch, action_dim)
    assert jnp.allclose(probs, ref, atol=1e-4, rtol=1e-4)
    assert jnp.allclose(jnp.sum(probs, axis=1), 1.0, atol=1e-4)

    # Also exercise the multi-step grid with a ragged last tile
    # (B=1000 -> tb=256, 4 grid steps, last block partial).
    big_b = 1000
    x_big = jax.random.normal(kx2, (big_b, state_dim), dtype=jnp.float32)
    probs_big = policy_net_discrete(x_big, w1, b1, w2, b2)
    jax.block_until_ready(probs_big)
    ref_big = _reference(x_big, w1, b1, w2, b2)
    assert probs_big.shape == (big_b, action_dim)
    assert jnp.allclose(probs_big, ref_big, atol=1e-4, rtol=1e-4)
    assert jnp.allclose(jnp.sum(probs_big, axis=1), 1.0, atol=1e-4)

    print("KERNEL_OK")
</pallas_src>

<mosaic_0001>
module attributes {stable_mosaic.version = 11 : i64} {
  func.func @_policy_kernel(%arg0: i32, %arg1: memref<8x4xf32, #tpu.memory_space<vmem>>, %arg2: memref<4x32xf32, #tpu.memory_space<vmem>>, %arg3: memref<1x32xf32, #tpu.memory_space<vmem>>, %arg4: memref<32x2xf32, #tpu.memory_space<vmem>>, %arg5: memref<1x2xf32, #tpu.memory_space<vmem>>, %arg6: memref<8x2xf32, #tpu.memory_space<vmem>>) attributes {dimension_semantics = [#tpu.dimension_semantics<parallel>], iteration_bounds = array<i64: 1>, scalar_prefetch = 0 : i64, scratch_operands = 0 : i64, tpu.core_type = #tpu.core_type<tc>, window_params = [{transform_indices = @transform_0, window_bounds = array<i64: 8, 4>}, {pipeline_mode = #tpu.pipeline_mode<synchronous>, transform_indices = @transform_1, window_bounds = array<i64: 4, 32>}, {pipeline_mode = #tpu.pipeline_mode<synchronous>, transform_indices = @transform_2, window_bounds = array<i64: 1, 32>}, {pipeline_mode = #tpu.pipeline_mode<synchronous>, transform_indices = @transform_3, window_bounds = array<i64: 32, 2>}, {pipeline_mode = #tpu.pipeline_mode<synchronous>, transform_indices = @transform_4, window_bounds = array<i64: 1, 2>}, {transform_indices = @transform_5, window_bounds = array<i64: 8, 2>}]} {
    %c0 = arith.constant 0 : index
    %c0_0 = arith.constant 0 : index
    %0 = vector.load %arg1[%c0, %c0_0] : memref<8x4xf32, #tpu.memory_space<vmem>>, vector<8x4xf32>
    %c0_1 = arith.constant 0 : index
    %c0_2 = arith.constant 0 : index
    %1 = vector.load %arg2[%c0_1, %c0_2] : memref<4x32xf32, #tpu.memory_space<vmem>>, vector<4x32xf32>
    %cst = arith.constant dense<0.000000e+00> : vector<8x32xf32>
    %2 = tpu.matmul %0, %1, %cst {dimension_numbers = #tpu.dot_dimension_numbers<[1], [0], [0], [1], [0, 0, 1, 1], [], []>} : vector<8x4xf32>, vector<4x32xf32>, vector<8x32xf32> -> vector<8x32xf32>
    %c0_3 = arith.constant 0 : index
    %c0_4 = arith.constant 0 : index
    %3 = vector.load %arg3[%c0_3, %c0_4] : memref<1x32xf32, #tpu.memory_space<vmem>>, vector<1x32xf32>
    %4 = vector.broadcast %3 : vector<1x32xf32> to vector<8x32xf32>
    %5 = arith.addf %2, %4 : vector<8x32xf32>
    %cst_5 = arith.constant 0.000000e+00 : f32
    %6 = vector.broadcast %cst_5 : f32 to vector<8x32xf32>
    %7 = arith.maximumf %5, %6 : vector<8x32xf32>
    %c0_6 = arith.constant 0 : index
    %c0_7 = arith.constant 0 : index
    %8 = vector.load %arg4[%c0_6, %c0_7] : memref<32x2xf32, #tpu.memory_space<vmem>>, vector<32x2xf32>
    %cst_8 = arith.constant dense<0.000000e+00> : vector<8x2xf32>
    %9 = tpu.matmul %7, %8, %cst_8 {dimension_numbers = #tpu.dot_dimension_numbers<[1], [0], [0], [1], [0, 0, 1, 1], [], []>} : vector<8x32xf32>, vector<32x2xf32>, vector<8x2xf32> -> vector<8x2xf32>
    %c0_9 = arith.constant 0 : index
    %c0_10 = arith.constant 0 : index
    %10 = vector.load %arg5[%c0_9, %c0_10] : memref<1x2xf32, #tpu.memory_space<vmem>>, vector<1x2xf32>
    %11 = vector.broadcast %10 : vector<1x2xf32> to vector<8x2xf32>
    %12 = arith.addf %9, %11 : vector<8x2xf32>
    %cst_11 = arith.constant dense<0xFF800000> : vector<8xf32>
    %13 = vector.multi_reduction <maximumf>, %12, %cst_11 [1] : vector<8x2xf32> to vector<8xf32>
    %14 = vector.shape_cast %13 : vector<8xf32> to vector<8x1xf32>
    %15 = vector.broadcast %14 : vector<8x1xf32> to vector<8x2xf32>
    %16 = arith.subf %12, %15 : vector<8x2xf32>
    %17 = math.exp %16 : vector<8x2xf32>
    %cst_12 = arith.constant dense<0.000000e+00> : vector<8xf32>
    %18 = vector.multi_reduction <add>, %17, %cst_12 [1] : vector<8x2xf32> to vector<8xf32>
    %19 = vector.shape_cast %18 : vector<8xf32> to vector<8x1xf32>
    %20 = tpu.reciprocal %19 {approx = true} : vector<8x1xf32> -> vector<8x1xf32>
    %21 = arith.mulf %19, %20 : vector<8x1xf32>
    %cst_13 = arith.constant 2.000000e+00 : f32
    %22 = vector.broadcast %cst_13 : f32 to vector<8x1xf32>
    %23 = arith.subf %22, %21 : vector<8x1xf32>
    %24 = arith.mulf %20, %23 : vector<8x1xf32>
    %25 = vector.broadcast %24 : vector<8x1xf32> to vector<8x2xf32>
    %26 = arith.mulf %17, %25 : vector<8x2xf32>
    %c0_14 = arith.constant 0 : index
    %c0_15 = arith.constant 0 : index
    %27 = vector.load %arg6[%c0_14, %c0_15] : memref<8x2xf32, #tpu.memory_space<vmem>>, vector<8x2xf32>
    tpu.vector_store %arg6[%c0_14, %c0_15], %26 {strides = array<i32>} : memref<8x2xf32, #tpu.memory_space<vmem>>, vector<8x2xf32>,
    return
  }
  func.func @transform_0(%arg0: i32) -> (i32, i32) {
    %c0_i32 = arith.constant 0 : i32
    %c0_i32_0 = arith.constant 0 : i32
    return %arg0, %c0_i32 : i32, i32
  }
  func.func @transform_1(%arg0: i32) -> (i32, i32) {
    %c0_i32 = arith.constant 0 : i32
    %c0_i32_0 = arith.constant 0 : i32
    %c0_i32_1 = arith.constant 0 : i32
    return %c0_i32, %c0_i32_0 : i32, i32
  }
  func.func @transform_2(%arg0: i32) -> (i32, i32) {
    %c0_i32 = arith.constant 0 : i32
    %c0_i32_0 = arith.constant 0 : i32
    %c0_i32_1 = arith.constant 0 : i32
    return %c0_i32, %c0_i32_0 : i32, i32
  }
  func.func @transform_3(%arg0: i32) -> (i32, i32) {
    %c0_i32 = arith.constant 0 : i32
    %c0_i32_0 = arith.constant 0 : i32
    %c0_i32_1 = arith.constant 0 : i32
    return %c0_i32, %c0_i32_0 : i32, i32
  }
  func.func @transform_4(%arg0: i32) -> (i32, i32) {
    %c0_i32 = arith.constant 0 : i32
    %c0_i32_0 = arith.constant 0 : i32
    %c0_i32_1 = arith.constant 0 : i32
    return %c0_i32, %c0_i32_0 : i32, i32
  }
  func.func @transform_5(%arg0: i32) -> (i32, i32) {
    %c0_i32 = arith.constant 0 : i32
    %c0_i32_0 = arith.constant 0 : i32
    return %arg0, %c0_i32 : i32, i32
  }
}

</mosaic_0001>

<bundles_post_ra>
// kernel: tpu_custom_call.1
= control target key start
LH: loop header
LB: loop body
LE: loop exit
PB: predicated region body
PF: predicated region fallthrough
CT: control target
= control target key end

     0   :  { %vm30_vm0 = vcmask 1043456   ;;  %vm26_vm1 = vcmask 31744   ;;  %vm63_vm2 = vcmask 261120   ;;  %vm87_vm3 = vcmask 15360   ;;  %s176_s1 = inlined_call_operand.vmem [shape: f32[4,32], index: 1, kind: input, shape index: {}]   ;;  %s177_s0 = inlined_call_operand.vmem [shape: f32[8,4], index: 0, kind: input, shape index: {}]   ;;  %s178_s3 = inlined_call_operand.vmem [shape: f32[32,2], index: 3, kind: input, shape index: {}]   ;;  %s179_s2 = inlined_call_operand.vmem [shape: f32[1,32], index: 2, kind: input, shape index: {}]   ;;  %s180_s4 = inlined_call_operand.vmem [shape: f32[1,2], index: 4, kind: input, shape index: {}]   ;;  %s181_s5 = inlined_call_operand.vmem [shape: f32[8,2], index: 5, kind: output, shape index: {}]  }
   0x1   :  { %v21_v0 = vld [vmem:[%s176_s1] sm:$0xf]  ;;  %v58_v2 = vld [vmem:[%s178_s3 + $0x18] sm:$0xff]  ;;  %v57_v3 = vld [vmem:[%s178_s3 + $0x10] sm:$0xff] }
   0x2   :  { %v20_v1 = vld [vmem:[%s177_s0] sm:$0xff]  ;;  %107 = vmatpush.msk.msra.mxu0 %vm30_vm0, %v21_v0  ;;  %79 = vmatpush.msra.mxu1 %v58_v2  ;;  %v56_v4 = vld [vmem:[%s178_s3 + $0x8] sm:$0xff] }
   0x3   :  { %108 = vmatmul.msk.f32.vlgmr.msra.gmra.mxu0 %vm26_vm1, %v20_v1  ;;  %v55_v5 = vld [vmem:[%s178_s3] sm:$0xff] }
   0x4   :  { %80 = vmatpush.msra.mxu1 %v57_v3  ;;  %v110_v6 = vld [vmem:[%s179_s2] ss:$0 sm:$0xff] }
   0x5   :  { %v111_v10 = vld [vmem:[%s180_s4] ss:$0 sm:$0xff] }
   0x6   :  { %81 = vmatpush.msra.mxu1 %v56_v4 }
   0x8   :  { %82 = vmatpush.msra.mxu1 %v55_v5 }
  0x80   :  { %v51_v7 = vpop.f32.mrf.mxu0 }
  0x81   :  { %v52_v8 = vadd.f32 %v110_v6, %v51_v7 }
  0x83   :  { %v54_v9 = vmax.f32 %v52_v8, 0.0 }
  0x85   :  { %109 = vmatmul.msk.f32.vlgmr.msra.gmra.mxu1 %vm63_vm2, %v54_v9 }
 0x102   :  { %v84_v11 = vpop.f32.mrf.mxu1 }
 0x103   :  { %v85_v12 = vadd.f32 %v111_v10, %v84_v11 }
 0x105   :  { %v88_v13 = vsel %vm87_vm3, %v85_v12, -inf }
 0x106   :  { %89 = vmax.xlane.f32.xlu0 %v88_v13 }
 0x179   :  { %v90_v14 = vpop.xlane.xlu0 %89 }
 0x17a   :  { %v91_v15 = vsub.f32 %v85_v12, %v90_v14 }
 0x17c   :  { %v92_v16 = vmul.f32 1.442695, %v91_v15 }
 0x17e   :  { %112 = vpow2.f32 %v92_v16 }
 0x184   :  { %v113_v17 = vpop.eup %112 }
 0x185   :  { %v94_v18 = vsel %vm87_vm3, %v113_v17, 0.0 }
 0x186   :  { %95 = vadd.xlane.f32.xlu0 %v94_v18 }
 0x1f9   :  { %v96_v19 = vpop.xlane.xlu0 %95 }
 0x1fa   :  { %114 = vrcp.f32 %v96_v19 }
 0x200   :  { %v115_v20 = vpop.eup %114 }
 0x201   :  { %v98_v21 = vmul.f32 %v115_v20, %v96_v19 }
 0x203   :  { %v99_v22 = vsub.f32 2.0, %v98_v21 }
 0x205   :  { %v100_v23 = vmul.f32 %v115_v20, %v99_v22 }
 0x207   :  { %v101_v24 = vmul.f32 %v113_v17, %v100_v23 }
 0x209   :  { %102 = vst.msk [vmem:[%s181_s5] sm:$0xff] %vm87_vm3, %v101_v24 }

</bundles_post_ra>
